<compile_context>
chip_gen: v7x
topology: tpu7x:2x2x1
jax: 0.10.0
libtpu: 0.0.40
codegen_flags: <defaults>
</compile_context>

<pallas_src>
import numpy as np
import jax
import jax.numpy as jnp
from jax.experimental import pallas as pl
from jax.experimental.pallas import tpu as pltpu


def _round_up(n, m):
    return ((n + m - 1) // m) * m


def _pad2d(x, rows, cols):
    return jnp.pad(x, ((0, rows - x.shape[0]), (0, cols - x.shape[1])))


def _sublane_granule(dtype):
    # f32 -> 8, bf16 -> 16 (sub-32-bit dtypes pack along sublanes)
    return max(8, 32 // jnp.dtype(dtype).itemsize)


# --------------------------------------------------------------------------- kernel
def type_scorer_kernel(x_ref,
                       w1_ref, b1_ref,
                       w2_ref, b2_ref,
                       w3_ref, b3_ref,
                       wout_ref, bout_ref,
                       out_ref,
                       mapped_ref):
    """Grid = (batch_tiles, num_type_tiles); num_types is the inner ("arbitrary") axis.

    The ffnn output `mapped` is computed once per batch tile (j == 0) into VMEM
    scratch and reused for every num_types tile of that batch tile.  This relies on
    the num_types axis being the last (innermost) grid axis.
    """
    # TODO(synk): torch.nn.Dropout is identity in eval mode; training-mode dropout
    # (random masking) is not implemented.

    @pl.when(pl.program_id(1) == 0)
    def _compute_mapped():
        act_dtype = mapped_ref.dtype
        # MXU accumulates f32 (preferred_element_type); bias add + tanh stay f32;
        # activations drop back to the compute dtype only for the next matmul.
        h = jnp.tanh(
            jnp.dot(x_ref[...], w1_ref[...], preferred_element_type=jnp.float32)
            + b1_ref[...]).astype(act_dtype)
        h = jnp.tanh(
            jnp.dot(h, w2_ref[...], preferred_element_type=jnp.float32)
            + b2_ref[...]).astype(act_dtype)
        mapped_ref[...] = jnp.tanh(
            jnp.dot(h, w3_ref[...], preferred_element_type=jnp.float32)
            + b3_ref[...]).astype(act_dtype)

    # Fused tied-linear + bottleneck: scores = mapped @ W_out + b_out  (f32 epilogue).
    out_ref[...] = (
        jnp.dot(mapped_ref[...], wout_ref[...], preferred_element_type=jnp.float32)
        + bout_ref[...]).astype(out_ref.dtype)


# --------------------------------------------------------------- parameter preparation
def prepare_type_scorer(params, *, compute_dtype=jnp.bfloat16):
    """Fold the bottleneck into the tied output linear (exact algebra), cast the
    matmul operands to the compute dtype (bf16 default: MXU-native on v5e/v6e/v7x,
    halves the streamed W_out HBM bytes), and zero-pad:
      * contraction / feature dims (input, hidden, type_dim) only to the sublane
        granule of the compute dtype (8 f32 / 16 bf16);
      * num_types (output lanes) to 128 so output stores stay lane-dense.
    Biases stay f32 (they join the f32 MXU accumulator in the epilogue).
    Call once per parameter set and cache the result (the fold is an
    O(type_dim * num_types) matmul — do NOT run it per forward call)."""
    d_in, hid = params["w1"].shape
    t_dim, n_types = params["wemb_t"].shape
    g = _sublane_granule(compute_dtype)

    # Exact fold:
    #   scores + bw*((m@Wb1+bb1)@Wb2+bb2) == m@(E^T + bw*Wb1@Wb2) + (blin + bw*(bb1@Wb2+bb2))
    w_out = params["wemb_t"] + params["bw"] * (params["wb1"] @ params["wb2"])
    b_out = params["blin"] + params["bw"] * (params["bb1"] @ params["wb2"] + params["bb2"])

    d_pad, h_pad, t_pad = _round_up(d_in, g), _round_up(hid, g), _round_up(t_dim, g)
    n_pad = _round_up(n_types, 128)

    kp = {
        "w1": _pad2d(params["w1"], d_pad, h_pad).astype(compute_dtype),
        "b1": _pad2d(params["b1"], 1, h_pad).astype(jnp.float32),
        "w2": _pad2d(params["w2"], h_pad, h_pad).astype(compute_dtype),
        "b2": _pad2d(params["b2"], 1, h_pad).astype(jnp.float32),
        "w3": _pad2d(params["w3"], h_pad, t_pad).astype(compute_dtype),
        "b3": _pad2d(params["b3"], 1, t_pad).astype(jnp.float32),
        "w_out": _pad2d(w_out, t_pad, n_pad).astype(compute_dtype),
        "b_out": _pad2d(b_out, 1, n_pad).astype(jnp.float32),
    }
    dims = dict(d_in=d_in, d_pad=d_pad, h_pad=h_pad, t_pad=t_pad,
                n_types=n_types, n_pad=n_pad, compute_dtype=compute_dtype)
    return kp, dims


# ------------------------------------------------------------------ hardware / budgets
def _tpu_vmem_cap_bytes():
    """Usable VMEM budget per TensorCore, leaving headroom for Mosaic internal
    scratch / semaphores / pipeline buffers.  Conservative 64 MiB fallback (v7x)."""
    phys = 64 << 20
    try:
        info = pltpu.get_tpu_info()
        phys = int(getattr(info, "vmem_capacity_bytes", phys))
    except Exception:
        pass
    headroom = max(12 << 20, phys // 8)   # 52 MiB on 64 MiB chips, 112 MiB on 128 MiB
    return max(phys - headroom, 32 << 20)


def _num_tensorcores():
    try:
        info = pltpu.get_tpu_info()
        for attr in ("num_cores", "tensorcore_count", "num_tensorcores", "core_count"):
            v = getattr(info, attr, None)
            if v:
                return int(v)
    except Exception:
        pass
    return 1


def _vmem_estimate_bytes(*, tile_b, tile_n, d_pad, h_pad, t_pad, cbytes, obytes):
    """Counts only VMEM-resident tiles (double-buffered) + mapped scratch + margin."""
    dbl = 2
    x_t = tile_b * d_pad * cbytes
    wout_t = t_pad * tile_n * cbytes
    bout_t = tile_n * 4
    out_t = tile_b * tile_n * obytes
    const_w = (d_pad * h_pad + h_pad * h_pad + h_pad * t_pad) * cbytes \
              + (2 * h_pad + t_pad) * 4
    mapped = tile_b * t_pad * cbytes
    return dbl * (x_t + wout_t + bout_t + out_t + const_w) + mapped + (8 << 20)


def _shrink_tile(tile, total):
    t = tile - 128
    while t > 128 and total % t:
        t -= 128
    return max(t, 128)


# -------------------------------------------------------------------------- forward
def type_scorer_forward(features, kp, dims, *, tile_b=None, tile_n=None,
                        out_dtype=jnp.float32):
    """features: [B, input_dim] float32.  (kp, dims) from prepare_type_scorer (cached).
    tile_b / tile_n must be multiples of 128; None -> auto selection against the
    per-chip VMEM budget (keeps >=2 batch tiles when the chip has >1 TensorCore)."""
    B, d_in = features.shape
    assert d_in == dims["d_in"]
    d_pad, h_pad, t_pad = dims["d_pad"], dims["h_pad"], dims["t_pad"]
    n_pad, n_types = dims["n_pad"], dims["n_types"]
    compute_dtype = dims["compute_dtype"]
    cbytes = jnp.dtype(compute_dtype).itemsize
    obytes = jnp.dtype(out_dtype).itemsize

    cap = _tpu_vmem_cap_bytes()
    b_pad = _round_up(B, 128)

    # num_types tile: 256 feeds the 256-wide MXU on v6e/v7x (fine on v5e's 128-wide);
    # snapped to a 128-multiple that divides n_pad.
    tile_n = 256 if tile_n is None else tile_n
    assert tile_n % 128 == 0
    tile_n = min(tile_n, n_pad)
    while n_pad % tile_n:
        tile_n -= 128

    # batch tile: W_out is re-streamed from HBM once per batch tile, so bigger tile_b
    # directly raises arithmetic intensity of the dominant matmul.
    tile_b = 512 if tile_b is None else tile_b
    assert tile_b % 128 == 0
    tile_b = min(tile_b, b_pad)
    while b_pad % tile_b:
        tile_b -= 128
    # keep >=2 batch tiles when the chip has >1 TensorCore so the "parallel" axis shards.
    if _num_tensorcores() > 1 and b_pad >= 256 and b_pad // tile_b < 2:
        tile_b = max(t for t in range(128, b_pad, 128) if b_pad % t == 0)

    def est():
        return _vmem_estimate_bytes(tile_b=tile_b, tile_n=tile_n, d_pad=d_pad,
                                    h_pad=h_pad, t_pad=t_pad,
                                    cbytes=cbytes, obytes=obytes)

    while est() > cap and tile_b > 128:
        tile_b = _shrink_tile(tile_b, b_pad)
    while est() > cap and tile_n > 128:
        tile_n = _shrink_tile(tile_n, n_pad)

    x = _pad2d(features, b_pad, d_pad).astype(compute_dtype)
    grid = (b_pad // tile_b, n_pad // tile_n)
    # Constant-index weight blocks are never re-DMA'd across the grid; single-buffering
    # them (pipeline_mode=pl.Buffered(1)) would only reclaim VMEM, which is not the
    # binding constraint at these sizes, so we stay on the default pipeline.
    const = lambda shape: pl.BlockSpec(shape, lambda i, j: (0, 0))

    out = pl.pallas_call(
        type_scorer_kernel,
        out_shape=jax.ShapeDtypeStruct((b_pad, n_pad), out_dtype),
        grid_spec=pltpu.PrefetchScalarGridSpec(
            num_scalar_prefetch=0,
            grid=grid,
            in_specs=[
                pl.BlockSpec((tile_b, d_pad), lambda i, j: (i, 0)),   # features tile
                const((d_pad, h_pad)), const((1, h_pad)),             # w1, b1
                const((h_pad, h_pad)), const((1, h_pad)),             # w2, b2
                const((h_pad, t_pad)), const((1, t_pad)),             # w3, b3
                pl.BlockSpec((t_pad, tile_n), lambda i, j: (0, j)),   # fused W_out tile
                pl.BlockSpec((1, tile_n), lambda i, j: (0, j)),       # fused b_out tile
            ],
            out_specs=pl.BlockSpec((tile_b, tile_n), lambda i, j: (i, j)),
            scratch_shapes=[pltpu.VMEM((tile_b, t_pad), compute_dtype)],  # mapped
        ),
        compiler_params=pltpu.CompilerParams(
            dimension_semantics=("parallel", "arbitrary"),
            vmem_limit_bytes=int(min(max(est(), 16 << 20), cap)),
        ),
    )(x, kp["w1"], kp["b1"], kp["w2"], kp["b2"], kp["w3"], kp["b3"],
      kp["w_out"], kp["b_out"])

    return out[:B, :n_types]


# -------------------------------------------------------------- params / reference
def make_params(key, input_dim, type_dim, num_types, bottleneck_dim):
    """Deterministic synthetic parameters, laid out for the kernel (x @ W convention)."""
    ks = jax.random.split(key, 10)
    hid = input_dim // 2
    scale = 0.1

    emb = scale * jax.random.normal(ks[0], (num_types, type_dim), jnp.float32)

    return {
        # ffnn (stored transposed: [in, out])
        "w1": scale * jax.random.normal(ks[1], (input_dim, hid), jnp.float32),
        "b1": scale * jax.random.normal(ks[2], (1, hid), jnp.float32),
        "w2": scale * jax.random.normal(ks[3], (hid, hid), jnp.float32),
        "b2": scale * jax.random.normal(ks[4], (1, hid), jnp.float32),
        "w3": scale * jax.random.normal(ks[5], (hid, type_dim), jnp.float32),
        "b3": scale * jax.random.normal(ks[6], (1, type_dim), jnp.float32),
        # tied output linear: weight = type embeddings -> kernel uses E^T  [type_dim, num_types]
        "wemb_t": emb.T,
        "blin": scale * jax.random.normal(ks[7], (1, num_types), jnp.float32),
        # bottleneck
        "wb1": scale * jax.random.normal(ks[8], (type_dim, bottleneck_dim), jnp.float32),
        "bb1": jnp.zeros((1, bottleneck_dim), jnp.float32),
        "wb2": scale * jax.random.normal(ks[9], (bottleneck_dim, num_types), jnp.float32),
        "bb2": jnp.zeros((1, num_types), jnp.float32),
        # bottleneck_weight parameter, initialized to 0.1 as in the module
        "bw": jnp.full((1, 1), 0.1, jnp.float32),
    }


def reference_forward(features, p):
    """Unfused, unpadded f32 reference matching the PyTorch module (eval mode)."""
    h = jnp.tanh(features @ p["w1"] + p["b1"])
    h = jnp.tanh(h @ p["w2"] + p["b2"])
    mapped = jnp.tanh(h @ p["w3"] + p["b3"])
    scores = mapped @ p["wemb_t"] + p["blin"]
    bn = (mapped @ p["wb1"] + p["bb1"]) @ p["wb2"] + p["bb2"]
    return scores + p["bw"] * bn


if __name__ == "__main__":
    # Small shapes consistent with the module; batch / num_types chosen so that with
    # explicit 128-tiles both grid axes take >1 step (exercises the pl.when reuse path).
    B, input_dim, type_dim, num_types, bottleneck_dim = 200, 32, 16, 200, 8

    key = jax.random.PRNGKey(0)
    k_feat, k_params = jax.random.split(key)
    features = jax.random.normal(k_feat, (B, input_dim), jnp.float32)
    params = make_params(k_params, input_dim, type_dim, num_types, bottleneck_dim)
    ref = reference_forward(features, params)

    # 1) f32 path with explicit small tiles (grid (2,2): exercises per-batch-tile
    #    mapped-scratch reuse across num_types tiles) -- tight tolerance.
    kp32, dims32 = prepare_type_scorer(params, compute_dtype=jnp.float32)
    out32 = jax.block_until_ready(
        type_scorer_forward(features, kp32, dims32, tile_b=128, tile_n=128))
    np.testing.assert_allclose(np.asarray(out32), np.asarray(ref), rtol=1e-5, atol=1e-5)

    # 2) production path: bf16 weights/activations (f32 accumulation + epilogue),
    #    auto tile selection and per-chip VMEM budget -- bf16-level tolerance.
    kp16, dims16 = prepare_type_scorer(params)      # bf16 default
    out16 = jax.block_until_ready(type_scorer_forward(features, kp16, dims16))
    np.testing.assert_allclose(np.asarray(out16), np.asarray(ref), rtol=5e-2, atol=5e-2)

    print("KERNEL_OK")
</pallas_src>

<mosaic_0001>
module attributes {stable_mosaic.version = 11 : i64} {
  func.func @type_scorer_kernel(%arg0: i32, %arg1: i32, %arg2: memref<128x32xf32, #tpu.memory_space<vmem>>, %arg3: memref<32x16xf32, #tpu.memory_space<vmem>>, %arg4: memref<1x16xf32, #tpu.memory_space<vmem>>, %arg5: memref<16x16xf32, #tpu.memory_space<vmem>>, %arg6: memref<1x16xf32, #tpu.memory_space<vmem>>, %arg7: memref<16x16xf32, #tpu.memory_space<vmem>>, %arg8: memref<1x16xf32, #tpu.memory_space<vmem>>, %arg9: memref<16x128xf32, #tpu.memory_space<vmem>>, %arg10: memref<1x128xf32, #tpu.memory_space<vmem>>, %arg11: memref<128x128xf32, #tpu.memory_space<vmem>>, %arg12: memref<128x16xf32, #tpu.memory_space<vmem>>) attributes {dimension_semantics = [#tpu.dimension_semantics<parallel>, #tpu.dimension_semantics<arbitrary>], iteration_bounds = array<i64: 2, 2>, scalar_prefetch = 0 : i64, scratch_operands = 1 : i64, tpu.core_type = #tpu.core_type<tc>, window_params = [{transform_indices = @transform_0, window_bounds = array<i64: 128, 32>}, {pipeline_mode = #tpu.pipeline_mode<synchronous>, transform_indices = @transform_1, window_bounds = array<i64: 32, 16>}, {pipeline_mode = #tpu.pipeline_mode<synchronous>, transform_indices = @transform_2, window_bounds = array<i64: 1, 16>}, {pipeline_mode = #tpu.pipeline_mode<synchronous>, transform_indices = @transform_3, window_bounds = array<i64: 16, 16>}, {pipeline_mode = #tpu.pipeline_mode<synchronous>, transform_indices = @transform_4, window_bounds = array<i64: 1, 16>}, {pipeline_mode = #tpu.pipeline_mode<synchronous>, transform_indices = @transform_5, window_bounds = array<i64: 16, 16>}, {pipeline_mode = #tpu.pipeline_mode<synchronous>, transform_indices = @transform_6, window_bounds = array<i64: 1, 16>}, {transform_indices = @transform_7, window_bounds = array<i64: 16, 128>}, {transform_indices = @transform_8, window_bounds = array<i64: 1, 128>}, {transform_indices = @transform_9, window_bounds = array<i64: 128, 128>}]} {
    %c0_i32 = arith.constant 0 : i32
    %0 = arith.cmpi eq, %arg1, %c0_i32 : i32
    %1 = arith.extui %0 : i1 to i32
    %c0_i32_0 = arith.constant 0 : i32
    %2 = arith.cmpi ne, %1, %c0_i32_0 : i32
    scf.if %2 {
      %c0_8 = arith.constant 0 : index
      %c0_9 = arith.constant 0 : index
      %10 = vector.load %arg2[%c0_8, %c0_9] : memref<128x32xf32, #tpu.memory_space<vmem>>, vector<128x32xf32>
      %c0_10 = arith.constant 0 : index
      %c0_11 = arith.constant 0 : index
      %11 = vector.load %arg3[%c0_10, %c0_11] : memref<32x16xf32, #tpu.memory_space<vmem>>, vector<32x16xf32>
      %cst_12 = arith.constant dense<0.000000e+00> : vector<128x16xf32>
      %12 = tpu.matmul %10, %11, %cst_12 {dimension_numbers = #tpu.dot_dimension_numbers<[1], [0], [0], [1], [0, 0, 1, 1], [], []>} : vector<128x32xf32>, vector<32x16xf32>, vector<128x16xf32> -> vector<128x16xf32>
      %c0_13 = arith.constant 0 : index
      %c0_14 = arith.constant 0 : index
      %13 = vector.load %arg4[%c0_13, %c0_14] : memref<1x16xf32, #tpu.memory_space<vmem>>, vector<1x16xf32>
      %14 = vector.broadcast %13 : vector<1x16xf32> to vector<128x16xf32>
      %15 = arith.addf %12, %14 : vector<128x16xf32>
      %16 = math.tanh %15 : vector<128x16xf32>
      %c0_15 = arith.constant 0 : index
      %c0_16 = arith.constant 0 : index
      %17 = vector.load %arg5[%c0_15, %c0_16] : memref<16x16xf32, #tpu.memory_space<vmem>>, vector<16x16xf32>
      %cst_17 = arith.constant dense<0.000000e+00> : vector<128x16xf32>
      %18 = tpu.matmul %16, %17, %cst_17 {dimension_numbers = #tpu.dot_dimension_numbers<[1], [0], [0], [1], [0, 0, 1, 1], [], []>} : vector<128x16xf32>, vector<16x16xf32>, vector<128x16xf32> -> vector<128x16xf32>
      %c0_18 = arith.constant 0 : index
      %c0_19 = arith.constant 0 : index
      %19 = vector.load %arg6[%c0_18, %c0_19] : memref<1x16xf32, #tpu.memory_space<vmem>>, vector<1x16xf32>
      %20 = vector.broadcast %19 : vector<1x16xf32> to vector<128x16xf32>
      %21 = arith.addf %18, %20 : vector<128x16xf32>
      %22 = math.tanh %21 : vector<128x16xf32>
      %c0_20 = arith.constant 0 : index
      %c0_21 = arith.constant 0 : index
      %23 = vector.load %arg7[%c0_20, %c0_21] : memref<16x16xf32, #tpu.memory_space<vmem>>, vector<16x16xf32>
      %cst_22 = arith.constant dense<0.000000e+00> : vector<128x16xf32>
      %24 = tpu.matmul %22, %23, %cst_22 {dimension_numbers = #tpu.dot_dimension_numbers<[1], [0], [0], [1], [0, 0, 1, 1], [], []>} : vector<128x16xf32>, vector<16x16xf32>, vector<128x16xf32> -> vector<128x16xf32>
      %c0_23 = arith.constant 0 : index
      %c0_24 = arith.constant 0 : index
      %25 = vector.load %arg8[%c0_23, %c0_24] : memref<1x16xf32, #tpu.memory_space<vmem>>, vector<1x16xf32>
      %26 = vector.broadcast %25 : vector<1x16xf32> to vector<128x16xf32>
      %27 = arith.addf %24, %26 : vector<128x16xf32>
      %28 = math.tanh %27 : vector<128x16xf32>
      %c0_25 = arith.constant 0 : index
      %c0_26 = arith.constant 0 : index
      %29 = vector.load %arg12[%c0_25, %c0_26] : memref<128x16xf32, #tpu.memory_space<vmem>>, vector<128x16xf32>
      tpu.vector_store %arg12[%c0_25, %c0_26], %28 {strides = array<i32>} : memref<128x16xf32, #tpu.memory_space<vmem>>, vector<128x16xf32>,
    } else {
    }
    %c0 = arith.constant 0 : index
    %c0_1 = arith.constant 0 : index
    %3 = vector.load %arg12[%c0, %c0_1] : memref<128x16xf32, #tpu.memory_space<vmem>>, vector<128x16xf32>
    %c0_2 = arith.constant 0 : index
    %c0_3 = arith.constant 0 : index
    %4 = vector.load %arg9[%c0_2, %c0_3] : memref<16x128xf32, #tpu.memory_space<vmem>>, vector<16x128xf32>
    %cst = arith.constant dense<0.000000e+00> : vector<128x128xf32>
    %5 = tpu.matmul %3, %4, %cst {dimension_numbers = #tpu.dot_dimension_numbers<[1], [0], [0], [1], [0, 0, 1, 1], [], []>} : vector<128x16xf32>, vector<16x128xf32>, vector<128x128xf32> -> vector<128x128xf32>
    %c0_4 = arith.constant 0 : index
    %c0_5 = arith.constant 0 : index
    %6 = vector.load %arg10[%c0_4, %c0_5] : memref<1x128xf32, #tpu.memory_space<vmem>>, vector<1x128xf32>
    %7 = vector.broadcast %6 : vector<1x128xf32> to vector<128x128xf32>
    %8 = arith.addf %5, %7 : vector<128x128xf32>
    %c0_6 = arith.constant 0 : index
    %c0_7 = arith.constant 0 : index
    %9 = vector.load %arg11[%c0_6, %c0_7] : memref<128x128xf32, #tpu.memory_space<vmem>>, vector<128x128xf32>
    tpu.vector_store %arg11[%c0_6, %c0_7], %8 {strides = array<i32>} : memref<128x128xf32, #tpu.memory_space<vmem>>, vector<128x128xf32>,
    return
  }
  func.func @transform_0(%arg0: i32, %arg1: i32) -> (i32, i32) {
    %c0_i32 = arith.constant 0 : i32
    %c0_i32_0 = arith.constant 0 : i32
    return %arg0, %c0_i32 : i32, i32
  }
  func.func @transform_1(%arg0: i32, %arg1: i32) -> (i32, i32) {
    %c0_i32 = arith.constant 0 : i32
    %c0_i32_0 = arith.constant 0 : i32
    %c0_i32_1 = arith.constant 0 : i32
    return %c0_i32, %c0_i32_0 : i32, i32
  }
  func.func @transform_2(%arg0: i32, %arg1: i32) -> (i32, i32) {
    %c0_i32 = arith.constant 0 : i32
    %c0_i32_0 = arith.constant 0 : i32
    %c0_i32_1 = arith.constant 0 : i32
    return %c0_i32, %c0_i32_0 : i32, i32
  }
  func.func @transform_3(%arg0: i32, %arg1: i32) -> (i32, i32) {
    %c0_i32 = arith.constant 0 : i32
    %c0_i32_0 = arith.constant 0 : i32
    %c0_i32_1 = arith.constant 0 : i32
    return %c0_i32, %c0_i32_0 : i32, i32
  }
  func.func @transform_4(%arg0: i32, %arg1: i32) -> (i32, i32) {
    %c0_i32 = arith.constant 0 : i32
    %c0_i32_0 = arith.constant 0 : i32
    %c0_i32_1 = arith.constant 0 : i32
    return %c0_i32, %c0_i32_0 : i32, i32
  }
  func.func @transform_5(%arg0: i32, %arg1: i32) -> (i32, i32) {
    %c0_i32 = arith.constant 0 : i32
    %c0_i32_0 = arith.constant 0 : i32
    %c0_i32_1 = arith.constant 0 : i32
    return %c0_i32, %c0_i32_0 : i32, i32
  }
  func.func @transform_6(%arg0: i32, %arg1: i32) -> (i32, i32) {
    %c0_i32 = arith.constant 0 : i32
    %c0_i32_0 = arith.constant 0 : i32
    %c0_i32_1 = arith.constant 0 : i32
    return %c0_i32, %c0_i32_0 : i32, i32
  }
  func.func @transform_7(%arg0: i32, %arg1: i32) -> (i32, i32) {
    %c0_i32 = arith.constant 0 : i32
    %c0_i32_0 = arith.constant 0 : i32
    return %c0_i32, %arg1 : i32, i32
  }
  func.func @transform_8(%arg0: i32, %arg1: i32) -> (i32, i32) {
    %c0_i32 = arith.constant 0 : i32
    %c0_i32_0 = arith.constant 0 : i32
    return %c0_i32, %arg1 : i32, i32
  }
  func.func @transform_9(%arg0: i32, %arg1: i32) -> (i32, i32) {
    %c0_i32 = arith.constant 0 : i32
    return %arg0, %arg1 : i32, i32
  }
}

</mosaic_0001>

<bundles_post_ra>
// kernel: tpu_custom_call.1
= control target key start
LH: loop header
LB: loop body
LE: loop exit
PB: predicated region body
PF: predicated region fallthrough
CT: control target
= control target key end

     0   :  { %s2526_s0 = inlined_call_operand.vmem [shape: f32[256,32], index: 0, kind: input, shape index: {}]   ;;  %s2527_s1 = inlined_call_operand.vmem [shape: f32[32,16], index: 1, kind: input, shape index: {}]   ;;  %s2528_s2 = inlined_call_operand.vmem [shape: f32[1,16], index: 2, kind: input, shape index: {}]   ;;  %s2529_s3 = inlined_call_operand.vmem [shape: f32[16,16], index: 3, kind: input, shape index: {}]   ;;  %s2530_s4 = inlined_call_operand.vmem [shape: f32[1,16], index: 4, kind: input, shape index: {}]   ;;  %s2531_s5 = inlined_call_operand.vmem [shape: f32[16,16], index: 5, kind: input, shape index: {}]   ;;  %s2532_s6 = inlined_call_operand.vmem [shape: f32[1,16], index: 6, kind: input, shape index: {}]   ;;  %s2533_s7 = inlined_call_operand.vmem [shape: f32[16,256], index: 7, kind: input, shape index: {}]   ;;  %s2534_s8 = inlined_call_operand.vmem [shape: f32[1,256], index: 8, kind: input, shape index: {}]   ;;  %s2535_s9 = inlined_call_operand.hbm [shape: f32[256,256], index: 9, kind: output, shape index: {}]  }
   0x1   :  { %2543 = sst [smem:[#allocation13_spill]] %s2532_s6 }
   0x2   :  { %2544 = sst [smem:[#allocation14_spill]] %s2533_s7 }
   0x3   :  { %2545 = sst [smem:[#allocation15_spill]] %s2535_s9 }
   0x4   :  { %14 = vsyncpa [#allocation5], 0 }
   0x5   :  { %16 = vsyncpa [#allocation5 + $0x1], 0  ;;  %s2120_s30 = smov 0   ;;  %s2122_s10 = smov 0  }
   0x6   :  { %s2124_s11 = smov 0   ;;  %s2126_s12 = smov 0  }
   0x7   :  { %s2128_s13 = smov 0   ;;  %s2130_s14 = smov 0  }
   0x8   :  { %s2132_s15 = smov 0   ;;  %s2134_s16 = smov 0  }
   0x9   :  { %s2136_s17 = smov 0   ;;  %s2138_s18 = smov 0  }
   0xa LB: > { %2546 = sst [smem:[#allocation7_spill]] %s2044_s13  ;;  %s1467_s19 = sadd.s32 4294967295, %s2064_s18   ;;  %s2064_s18 = sphi %s2138_s18, %s22_s18   ;;  %s2060_s17 = sphi %s2136_s17, %s2564_s17   ;;  %s2056_s16 = sphi %s2134_s16, %s2563_s16   ;;  %s2052_s15 = sphi %s2132_s15, %s2562_s15   ;;  %s2048_s14 = sphi %s2130_s14, %s2561_s14   ;;  %s2044_s13 = sphi %s2128_s13, %s2560_s13   ;;  %s2040_s12 = sphi %s2126_s12, %s2559_s12   ;;  %s2036_s11 = sphi %s2124_s11, %s2567_s11   ;;  %s2032_s10 = sphi %s2122_s10, %s2566_s10   ;;  %s2028_s30 = sphi %s2120_s30, %s2565_s30  }
   0xb   : > { %2547 = sst [smem:[#allocation8_spill]] %s2056_s16  ;;  %s1468_s20 = sadd.s32 4294967294, %s2064_s18  }
   0xc   : > { %2548 = sst [smem:[#allocation9_spill]] %s2060_s17  ;;  %s31_s21 = sadd.s32 1, %s2056_s16 }
   0xd   : > { %s34_s22 = sadd.s32 1, %s2060_s17  ;;  %p32_p0 = scmp.ge.s32.totalorder %s31_s21, 2 }
   0xe   : > { %s193_s23 = sadd.s32 1, %s2044_s13  ;;  %p200_p1 = scmp.ne.s32.totalorder %s2044_s13, %s2040_s12 }
   0xf   : > { %p201_p2 = scmp.eq.s32.totalorder %s2064_s18, 0  ;;  %s2569_s21 = smov (%p32_p0, %s31_s21), 0 }
  0x10   : > { %2549 = sst [smem:[#allocation10_spill]] %s2569_s21  ;;  %s2571_s22 = smov (!%p32_p0, %s34_s22), %s2060_s17 }
  0x11   : > { %s190_s24 = ssub.s32 %s2056_s16, %s2569_s21  ;;  %p2183_p3 = por %p201_p2, %p200_p1 }
  0x12   : > { %p36_p4 = scmp.ge.s32.totalorder %s2571_s22, 2  ;;  %p191_p5 = scmp.eq.s32.totalorder %s190_s24, 0 }
  0x13   : > { %s247_s26 = sadd.s32 1, %s2036_s11  ;;  %p257_p6 = scmp.ne.s32.totalorder %s2036_s11, %s2032_s10 }
  0x14   : > { %s2573_s22 = smov (%p36_p4, %s2571_s22), 0  ;;  %p258_p7 = scmp.eq.s32.totalorder %s1467_s19, 3 }
  0x15   : > { %2551 = sst [smem:[#allocation11_spill]] %s2573_s22  ;;  %s242_s28 = ssub.s32 %s2060_s17, %s2573_s22 }
  0x16   : > { %s2193_s27 = scalar_select %p191_p5, %s2044_s13, %s193_s23  }
  0x17   : > { %s244_s29 = sor.u32 %s242_s28, %s190_s24  ;;  %p263_p8 = scmp.ne.s32.totalorder %s2032_s10, %s2028_s30 }
  0x18   : > { %2552 = sst [smem:[#allocation12_spill]] %s2193_s27  ;;  %p245_p9 = scmp.eq.s32.totalorder %s244_s29, 0 }
  0x19   : > { %p2199_p10 = por %p258_p7, %p257_p6  ;;  %p264_p11 = scmp.eq.s32.totalorder %s1468_s20, 3 }
  0x1a   : > { %s2204_s9 = scalar_select %p245_p9, %s2036_s11, %s247_s26  }
  0x1b   : > { %p2206_p12 = por %p264_p11, %p263_p8  ;;  %p1470_p13 = scmp.ge.s32.totalorder %s2064_s18, 4 }
  0x1d   : > { %298 = sbr.rel (%p1470_p13) target bundleno = 47 (0x2f), region = 40 }
  0x24   : > { %310 = sbr.rel (!%p2183_p3) target bundleno = 47 (0x2f), region = 48  ;;  %s312_s19 = sand.u32 (%p2183_p3), 1, %s2044_s13  }
  0x25   : > { %s1472_s23 = sshll.u32 (%p2183_p3), %s2056_s16, 3  ;;  %s1471_s24 = sshll.u32 (%p2183_p3), %s312_s19, 4 }
  0x26   : > { %s2555_s7 = sld [smem:[#allocation14_spill]] (%p2183_p3)  ;;  %s314_s26 = scalar_lea.vmem (%p2183_p3), [#allocation3], %s1471_s24 }
  0x2c   : > { %s316_s20 = scalar_lea.vmem %s2555_s7, %s1472_s23 }
  0x2d   : > { %v346_v0 = vld [vmem:[%s316_s20] sm:$0xff]  ;;  %v348_v1 = vld [vmem:[%s316_s20 + $0x10] sm:$0xff] }
  0x2e   : > { %347 = vst [vmem:[%s314_s26] sm:$0xff] %v346_v0  ;;  %349 = vst [vmem:[%s314_s26 + $0x8] sm:$0xff] %v348_v1 }
  0x2f PF: > { %p1473_p0 = scmp.ge.s32.totalorder %s2064_s18, 1  ;;  %p360_p1 = scmp.lt.s32.totalorder %s2064_s18, 5 }
  0x31   : > { %p361_p2 = pnand %p1473_p0, %p360_p1 }
  0x32   : > { %s367_s25 = sand.u32 (!%p361_p2), 1, %s2040_s12   ;;  %s2541_s19 = sand.u32 (!%p361_p2), 1, %s2032_s10  }
  0x33   : > { %364 = sbr.rel (%p361_p2) target bundleno = 1031 (0x407), region = 90  ;;  %s2222_s23 = sshll.u32 (!%p361_p2), %s367_s25, 4 }
  0x34   : > { %s1475_s24 = sshll.u32 (!%p361_p2), %s2541_s19, 7  ;;  %s1476_s28 = sshll.u32 (!%p361_p2), %s2052_s15, 4 }
  0x35   : > { %p416_p3 = scmp.lt.s32.totalorder (!%p361_p2), %s2048_s14, 1  ;;  %p411_p4 = scmp.lt.s32.totalorder (!%p361_p2), %s1476_s28, 31 }
  0x36   : > { %s369_s16 = scalar_lea.vmem (!%p361_p2), [#allocation3], %s2222_s23  ;;  %s2241_s27 = scalar_lea.vmem (!%p361_p2), [#allocation4], %s1475_s24 }
  0x37   : > { %p1478_p5 = scmp.ne.s32.totalorder (!%p361_p2), %s2048_s14, 0 }
  0x3a   : > { %s2229_s29 = scalar_select %p416_p3, %s2048_s14, 1 }
  0x3b   : > { %s2575_s28 = smov (!%p411_p4, %s1476_s28), 31  ;;  %423 = sbr.rel (%p1478_p5) target bundleno = 780 (0x30c), region = 98 }
  0x3c   : > { %s418_s7 = scalar_lea.vmem %s2534_s8, %s2229_s29  ;;  %s1477_s22 = sshll.u32 %s2575_s28, 3  ;;  %v440_v2 = vld [vmem:[%s2527_s1] sm:$0xff] (!%p1478_p5)  ;;  %v441_v3 = vld [vmem:[%s2527_s1 + $0x8] sm:$0xff] (!%p1478_p5)  ;;  %v442_v4 = vld [vmem:[%s2527_s1 + $0x10] sm:$0xff] (!%p1478_p5)  ;;  %vm451_vm0 = vcmask (!%p1478_p5), 261120   ;;  %vm670_vm1 = vcmask (!%p1478_p5), 130048  }
  0x3d   : > { %s2238_s25 = scalar_lea.vmem %s2526_s0, %s1477_s22  ;;  %v1744_v5 = vpack.c.bf16 (!%p1478_p5), %v441_v3, %v440_v2  ;;  %v443_v6 = vld [vmem:[%s2527_s1 + $0x18] sm:$0xff] (!%p1478_p5)  ;;  %v661_v9 = vld [vmem:[%s2529_s3] sm:$0xff] (!%p1478_p5)  ;;  %v662_v10 = vld [vmem:[%s2529_s3 + $0x8] sm:$0xff] (!%p1478_p5)  ;;  %s2556_s26 = sld [smem:[#allocation13_spill]] (!%p1478_p5) }
  0x3e   : > { %v424_v7 = vld [vmem:[%s2238_s25] sm:$0xff] (!%p1478_p5)  ;;  %v1748_v8 = vpack.c.bf16 (!%p1478_p5), %v443_v6, %v442_v4  ;;  %v425_v11 = vld [vmem:[%s2238_s25 + $0x8] sm:$0xff] (!%p1478_p5)  ;;  %v1752_v12 = vpack.c.bf16 (!%p1478_p5), %v662_v10, %v661_v9  ;;  %v426_v13 = vld [vmem:[%s2238_s25 + $0x10] sm:$0xff] (!%p1478_p5) }
  0x3f   : > { %1636 = vmatprep.mubr.msk.f32.mxu0 (!%p1478_p5), %vm451_vm0, %v424_v7  ;;  %1745 = vmatprep.subr.bf16.mxu0 (!%p1478_p5), %v1744_v5  ;;  %v427_v14 = vld [vmem:[%s2238_s25 + $0x18] sm:$0xff] (!%p1478_p5)  ;;  %v428_v15 = vld [vmem:[%s2238_s25 + $0x20] sm:$0xff] (!%p1478_p5)  ;;  %v429_v16 = vld [vmem:[%s2238_s25 + $0x28] sm:$0xff] (!%p1478_p5) }
  0x40   : > { %1747 = vmatpush3.bf16.msra.mxu0 (!%p1478_p5), %v1744_v5  ;;  %1764 = vmatprep.subr.bf16.mxu1 (!%p1478_p5), %v1752_v12  ;;  %v430_v17 = vld [vmem:[%s2238_s25 + $0x30] sm:$0xff] (!%p1478_p5)  ;;  %v431_v18 = vld [vmem:[%s2238_s25 + $0x38] sm:$0xff] (!%p1478_p5)  ;;  %v432_v19 = vld [vmem:[%s2238_s25 + $0x40] sm:$0xff] (!%p1478_p5) }
  0x41   : > { %1749 = vmatprep.subr.bf16.mxu0 (!%p1478_p5), %v1748_v8  ;;  %1765 = vmatpush3.bf16.msra.mxu1 (!%p1478_p5), %v1752_v12  ;;  %v433_v20 = vld [vmem:[%s2238_s25 + $0x48] sm:$0xff] (!%p1478_p5)  ;;  %v434_v21 = vld [vmem:[%s2238_s25 + $0x50] sm:$0xff] (!%p1478_p5)  ;;  %v435_v22 = vld [vmem:[%s2238_s25 + $0x58] sm:$0xff] (!%p1478_p5) }
  0x42   : > { %v436_v23 = vld [vmem:[%s2238_s25 + $0x60] sm:$0xff]  ;;  %v437_v24 = vld [vmem:[%s2238_s25 + $0x68] sm:$0xff]  ;;  %v438_v25 = vld [vmem:[%s2238_s25 + $0x70] sm:$0xff] }
  0x43   : > { %v439_v26 = vld [vmem:[%s2238_s25 + $0x78] sm:$0xff]  ;;  %v880_v27 = vld [vmem:[%s2531_s5] sm:$0xff]  ;;  %v881_v28 = vld [vmem:[%s2531_s5 + $0x8] sm:$0xff] }
  0x44   : > { %1751 = vmatpush3.bf16.msra.mxu0 %v1748_v8  ;;  %v2300_v29 = vpack.c.bf16 %v881_v28, %v880_v27  ;;  %v2306_v30 = vld [vmem:[%s2528_s2] ss:$0 sm:$0xff] }
  0x45   : > { %1753 = vmatprep.subr.bf16.mxu0 %v1752_v12 }
  0x46   : > { %1757 = vmatprep.subr.bf16.mxu1 %v2300_v29 }
  0x47   : > { %1637 = vmatmul.mubr.msk.f32.vlgmr.msra.gmra.mrb[0].mxu0 %vm451_vm0, %v425_v11 }
  0x48   : > { %1639 = vmatprep.mubr.msk.f32.mxu0 %vm451_vm0, %v426_v13  ;;  %1755 = vmatpush3.bf16.msra.mxu0 %v1752_v12 }
  0x4b   : > { %1640 = vmatmul.mubr.msk.f32.gmra.mrb[2].mxu0 %vm451_vm0, %v427_v14 }
  0x4c   : > { %1642 = vmatprep.mubr.msk.f32.mxu0 %vm451_vm0, %v428_v15  ;;  %v2344_v15 = vld [vmem:[%s2530_s4] ss:$0 sm:$0xff] }
  0x4f   : > { %1643 = vmatmul.mubr.msk.f32.gmra.mrb[4].mxu0 %vm451_vm0, %v429_v16 }
  0x50   : > { %1645 = vmatprep.mubr.msk.f32.mxu0 %vm451_vm0, %v430_v17 }
  0x53   : > { %1646 = vmatmul.mubr.msk.f32.gmra.mrb[6].mxu0 %vm451_vm0, %v431_v18 }
  0x54   : > { %1648 = vmatprep.mubr.msk.f32.mxu0 %vm451_vm0, %v432_v19 }
  0x57   : > { %1649 = vmatmul.mubr.msk.f32.gmra.mrb[8].mxu0 %vm451_vm0, %v433_v20 }
  0x58   : > { %1651 = vmatprep.mubr.msk.f32.mxu0 %vm451_vm0, %v434_v21 }
  0x5b   : > { %1652 = vmatmul.mubr.msk.f32.gmra.mrb[10].mxu0 %vm451_vm0, %v435_v22 }
  0x5c   : > { %1654 = vmatprep.mubr.msk.f32.mxu0 %vm451_vm0, %v436_v23 }
  0x5f   : > { %1655 = vmatmul.mubr.msk.f32.gmra.mrb[12].mxu0 %vm451_vm0, %v437_v24 }
  0x60   : > { %1657 = vmatprep.mubr.msk.f32.mxu0 %vm451_vm0, %v438_v25 }
  0x63   : > { %1658 = vmatmul.mubr.msk.f32.gmra.mrb[14].mxu0 %vm451_vm0, %v439_v26 }
 0x11a   : > { %v1638_v31 = vpop.f32.mrb[0].mxu0 }
 0x11b   : > { %v572_v32 = vadd.f32 %v1638_v31, %v2306_v30  ;;  %v566_v33 = vpop.f32.mrb[1].mxu0 }
 0x11c   : > { %v567_v34 = vadd.f32 %v2306_v30, %v566_v33 }
 0x11e   : > { %1858 = vtanh.f32 %v567_v34  ;;  %v1641_v35 = vpop.f32.mrb[2].mxu0 }
 0x11f   : > { %1860 = vtanh.f32 %v572_v32  ;;  %v582_v36 = vadd.f32 %v1641_v35, %v2306_v30  ;;  %v576_v37 = vpop.f32.mrb[3].mxu0 }
 0x120   : > { %v577_v38 = vadd.f32 %v2306_v30, %v576_v37 }
 0x122   : > { %1862 = vtanh.f32 %v577_v38  ;;  %v1644_v39 = vpop.f32.mrb[4].mxu0 }
 0x123   : > { %1864 = vtanh.f32 %v582_v36  ;;  %v592_v40 = vadd.f32 %v1644_v39, %v2306_v30  ;;  %v586_v41 = vpop.f32.mrb[5].mxu0 }
 0x124   : > { %v587_v42 = vadd.f32 %v2306_v30, %v586_v41 }
 0x126   : > { %1866 = vtanh.f32 %v587_v42  ;;  %v1647_v43 = vpop.f32.mrb[6].mxu0 }
 0x127   : > { %1868 = vtanh.f32 %v592_v40  ;;  %v602_v44 = vadd.f32 %v1647_v43, %v2306_v30  ;;  %v596_v45 = vpop.f32.mrb[7].mxu0 }
 0x128   : > { %v1859_v46 = vpop.eup %1858  ;;  %v597_v47 = vadd.f32 %v2306_v30, %v596_v45 }
 0x129   : > { %v1861_v48 = vpop.eup %1860  ;;  %1664 = vmatprep.mubr.msk.f32.mxu0 %vm670_vm1, %v1859_v46 }
 0x12a   : > { %1870 = vtanh.f32 %v597_v47  ;;  %v1650_v49 = vpop.f32.mrb[8].mxu0  ;;  %1665 = vmatmul.mubr.msk.f32.vlgmr.msra.gmra.mrb[16].mxu0 %vm670_vm1, %v1861_v48 }
 0x12b   : > { %1872 = vtanh.f32 %v602_v44  ;;  %v612_v50 = vadd.f32 %v1650_v49, %v2306_v30  ;;  %v606_v51 = vpop.f32.mrb[9].mxu0 }
 0x12c   : > { %v1863_v52 = vpop.eup %1862  ;;  %v607_v53 = vadd.f32 %v2306_v30, %v606_v51 }
 0x12d   : > { %v1865_v54 = vpop.eup %1864  ;;  %1667 = vmatprep.mubr.msk.f32.mxu0 %vm670_vm1, %v1863_v52 }
 0x12e   : > { %1874 = vtanh.f32 %v607_v53  ;;  %v1653_v55 = vpop.f32.mrb[10].mxu0  ;;  %1668 = vmatmul.mubr.msk.f32.gmra.mrb[18].mxu0 %vm670_vm1, %v1865_v54 }
 0x12f   : > { %1876 = vtanh.f32 %v612_v50  ;;  %v622_v56 = vadd.f32 %v1653_v55, %v2306_v30  ;;  %v616_v57 = vpop.f32.mrb[11].mxu0 }
 0x130   : > { %v1867_v58 = vpop.eup %1866  ;;  %v617_v59 = vadd.f32 %v2306_v30, %v616_v57 }
 0x131   : > { %v1869_v60 = vpop.eup %1868  ;;  %1670 = vmatprep.mubr.msk.f32.mxu0 %vm670_vm1, %v1867_v58 }
 0x132   : > { %1878 = vtanh.f32 %v617_v59  ;;  %v1656_v61 = vpop.f32.mrb[12].mxu0  ;;  %1671 = vmatmul.mubr.msk.f32.gmra.mrb[20].mxu0 %vm670_vm1, %v1869_v60 }
 0x133   : > { %1880 = vtanh.f32 %v622_v56  ;;  %v632_v62 = vadd.f32 %v1656_v61, %v2306_v30  ;;  %v626_v63 = vpop.f32.mrb[13].mxu0 }
 0x134   : > { %v1871_v0 = vpop.eup %1870  ;;  %v627_v1 = vadd.f32 %v2306_v30, %v626_v63 }
 0x135   : > { %v1873_v2 = vpop.eup %1872  ;;  %1673 = vmatprep.mubr.msk.f32.mxu1 %vm670_vm1, %v1871_v0  ;;  %v2381_v0 = vld [vmem:[%s2556_s26] ss:$0 sm:$0xff] }
 0x136   : > { %1882 = vtanh.f32 %v627_v1  ;;  %v1659_v3 = vpop.f32.mrb[14].mxu0  ;;  %1674 = vmatmul.mubr.msk.f32.vlgmr.msra.gmra.mrb[0].mxu1 %vm670_vm1, %v1873_v2 }
 0x137   : > { %1884 = vtanh.f32 %v632_v62  ;;  %v642_v4 = vadd.f32 %v1659_v3, %v2306_v30  ;;  %v636_v5 = vpop.f32.mrb[15].mxu0  ;;  %1759 = vmatpush3.bf16.msra.mxu1 %v2300_v29 }
 0x138   : > { %v1875_v6 = vpop.eup %1874  ;;  %v637_v7 = vadd.f32 %v2306_v30, %v636_v5 }
 0x139   : > { %v1877_v8 = vpop.eup %1876  ;;  %1676 = vmatprep.mubr.msk.f32.mxu1 %vm670_vm1, %v1875_v6 }
 0x13a   : > { %1886 = vtanh.f32 %v637_v7  ;;  %1677 = vmatmul.mubr.msk.f32.gmra.mrb[2].mxu1 %vm670_vm1, %v1877_v8 }
 0x13b   : > { %1888 = vtanh.f32 %v642_v4 }
 0x13c   : > { %v1879_v9 = vpop.eup %1878 }
 0x13d   : > { %v1881_v10 = vpop.eup %1880  ;;  %1679 = vmatprep.mubr.msk.f32.mxu1 %vm670_vm1, %v1879_v9 }
 0x13e   : > { %1680 = vmatmul.mubr.msk.f32.gmra.mrb[4].mxu1 %vm670_vm1, %v1881_v10 }
 0x140   : > { %v1883_v11 = vpop.eup %1882 }
 0x141   : > { %v1885_v12 = vpop.eup %1884  ;;  %1682 = vmatprep.mubr.msk.f32.mxu1 %vm670_vm1, %v1883_v11 }
 0x142   : > { %1683 = vmatmul.mubr.msk.f32.gmra.mrb[6].mxu1 %vm670_vm1, %v1885_v12 }
 0x144   : > { %v1887_v13 = vpop.eup %1886 }
 0x145   : > { %v1889_v14 = vpop.eup %1888  ;;  %1685 = vmatprep.mubr.msk.f32.mxu1 %vm670_vm1, %v1887_v13 }
 0x146   : > { %1686 = vmatmul.mubr.msk.f32.gmra.mrb[8].mxu1 %vm670_vm1, %v1889_v14 }
 0x1fd   : > { %v1666_v16 = vpop.f32.mrb[16].mxu0 }
 0x1fe   : > { %v791_v17 = vadd.f32 %v1666_v16, %v2344_v15  ;;  %v785_v18 = vpop.f32.mrb[17].mxu0 }
 0x1ff   : > { %v786_v19 = vadd.f32 %v2344_v15, %v785_v18 }
 0x201   : > { %1890 = vtanh.f32 %v786_v19  ;;  %v1669_v20 = vpop.f32.mrb[18].mxu0 }
 0x202   : > { %1892 = vtanh.f32 %v791_v17  ;;  %v801_v21 = vadd.f32 %v1669_v20, %v2344_v15  ;;  %v795_v22 = vpop.f32.mrb[19].mxu0 }
 0x203   : > { %v796_v23 = vadd.f32 %v2344_v15, %v795_v22 }
 0x205   : > { %1894 = vtanh.f32 %v796_v23  ;;  %v1672_v24 = vpop.f32.mrb[20].mxu0 }
 0x206   : > { %1896 = vtanh.f32 %v801_v21  ;;  %v811_v25 = vadd.f32 %v1672_v24, %v2344_v15  ;;  %v805_v26 = vpop.f32.mrb[21].mxu0 }
 0x207   : > { %v806_v27 = vadd.f32 %v2344_v15, %v805_v26 }
 0x209   : > { %1898 = vtanh.f32 %v806_v27  ;;  %v1675_v28 = vpop.f32.mrb[0].mxu1 }
 0x20a   : > { %1900 = vtanh.f32 %v811_v25  ;;  %v821_v29 = vadd.f32 %v1675_v28, %v2344_v15  ;;  %v815_v30 = vpop.f32.mrb[1].mxu1 }
 0x20b   : > { %v1891_v31 = vpop.eup %1890  ;;  %v816_v32 = vadd.f32 %v2344_v15, %v815_v30 }
 0x20c   : > { %v1893_v33 = vpop.eup %1892  ;;  %1692 = vmatprep.mubr.msk.f32.mxu1 %vm670_vm1, %v1891_v31 }
 0x20d   : > { %1902 = vtanh.f32 %v816_v32  ;;  %v1678_v34 = vpop.f32.mrb[2].mxu1  ;;  %1693 = vmatmul.mubr.msk.f32.vlgmr.msra.gmra.mrb[10].mxu1 %vm670_vm1, %v1893_v33 }
 0x20e   : > { %1904 = vtanh.f32 %v821_v29  ;;  %v831_v35 = vadd.f32 %v1678_v34, %v2344_v15  ;;  %v825_v36 = vpop.f32.mrb[3].mxu1 }
 0x20f   : > { %v1895_v37 = vpop.eup %1894  ;;  %v826_v38 = vadd.f32 %v2344_v15, %v825_v36 }
 0x210   : > { %v1897_v39 = vpop.eup %1896  ;;  %1695 = vmatprep.mubr.msk.f32.mxu1 %vm670_vm1, %v1895_v37 }
 0x211   : > { %1906 = vtanh.f32 %v826_v38  ;;  %v1681_v40 = vpop.f32.mrb[4].mxu1  ;;  %1696 = vmatmul.mubr.msk.f32.gmra.mrb[12].mxu1 %vm670_vm1, %v1897_v39 }
 0x212   : > { %1908 = vtanh.f32 %v831_v35  ;;  %v841_v41 = vadd.f32 %v1681_v40, %v2344_v15  ;;  %v835_v42 = vpop.f32.mrb[5].mxu1 }
 0x213   : > { %v1899_v43 = vpop.eup %1898  ;;  %v836_v44 = vadd.f32 %v2344_v15, %v835_v42 }
 0x214   : > { %v1901_v45 = vpop.eup %1900  ;;  %1698 = vmatprep.mubr.msk.f32.mxu1 %vm670_vm1, %v1899_v43 }
 0x215   : > { %1910 = vtanh.f32 %v836_v44  ;;  %v1684_v46 = vpop.f32.mrb[6].mxu1  ;;  %1699 = vmatmul.mubr.msk.f32.gmra.mrb[14].mxu1 %vm670_vm1, %v1901_v45 }
 0x216   : > { %1912 = vtanh.f32 %v841_v41  ;;  %v851_v47 = vadd.f32 %v1684_v46, %v2344_v15  ;;  %v845_v48 = vpop.f32.mrb[7].mxu1 }
 0x217   : > { %v1903_v49 = vpop.eup %1902  ;;  %v846_v50 = vadd.f32 %v2344_v15, %v845_v48 }
 0x218   : > { %v1905_v51 = vpop.eup %1904  ;;  %1701 = vmatprep.mubr.msk.f32.mxu1 %vm670_vm1, %v1903_v49 }
 0x219   : > { %1914 = vtanh.f32 %v846_v50  ;;  %v1687_v52 = vpop.f32.mrb[8].mxu1  ;;  %1702 = vmatmul.mubr.msk.f32.gmra.mrb[16].mxu1 %vm670_vm1, %v1905_v51 }
 0x21a   : > { %1916 = vtanh.f32 %v851_v47  ;;  %v861_v53 = vadd.f32 %v1687_v52, %v2344_v15  ;;  %v855_v54 = vpop.f32.mrb[9].mxu1 }
 0x21b   : > { %v1907_v55 = vpop.eup %1906  ;;  %v856_v56 = vadd.f32 %v2344_v15, %v855_v54 }
 0x21c   : > { %v1909_v57 = vpop.eup %1908  ;;  %1704 = vmatprep.mubr.msk.f32.mxu1 %vm670_vm1, %v1907_v55 }
 0x21d   : > { %1918 = vtanh.f32 %v856_v56  ;;  %1705 = vmatmul.mubr.msk.f32.gmra.mrb[18].mxu1 %vm670_vm1, %v1909_v57 }
 0x21e   : > { %1920 = vtanh.f32 %v861_v53 }
 0x21f   : > { %v1911_v58 = vpop.eup %1910 }
 0x220   : > { %v1913_v59 = vpop.eup %1912  ;;  %1707 = vmatprep.mubr.msk.f32.mxu1 %vm670_vm1, %v1911_v58 }
 0x221   : > { %1708 = vmatmul.mubr.msk.f32.gmra.mrb[20].mxu1 %vm670_vm1, %v1913_v59 }
 0x223   : > { %v1915_v60 = vpop.eup %1914 }
 0x224   : > { %v1917_v61 = vpop.eup %1916  ;;  %1710 = vmatprep.mubr.msk.f32.mxu1 %vm670_vm1, %v1915_v60 }
 0x225   : > { %1711 = vmatmul.mubr.msk.f32.gmra.mrb[22].mxu1 %vm670_vm1, %v1917_v61 }
 0x227   : > { %v1919_v62 = vpop.eup %1918 }
 0x228   : > { %v1921_v63 = vpop.eup %1920  ;;  %1713 = vmatprep.mubr.msk.f32.mxu1 %vm670_vm1, %v1919_v62 }
 0x229   : > { %1714 = vmatmul.mubr.msk.f32.gmra.mrb[24].mxu1 %vm670_vm1, %v1921_v63 }
 0x2e0   : > { %v1694_v1 = vpop.f32.mrb[10].mxu1 }
 0x2e1   : > { %v1009_v2 = vadd.f32 %v1694_v1, %v2381_v0  ;;  %v1003_v3 = vpop.f32.mrb[11].mxu1 }
 0x2e2   : > { %v1004_v4 = vadd.f32 %v2381_v0, %v1003_v3 }
 0x2e3   : > { %1922 = vtanh.f32 %v1009_v2 }
 0x2e4   : > { %1924 = vtanh.f32 %v1004_v4  ;;  %v1697_v5 = vpop.f32.mrb[12].mxu1 }
 0x2e5   : > { %v1019_v6 = vadd.f32 %v1697_v5, %v2381_v0  ;;  %v1013_v7 = vpop.f32.mrb[13].mxu1 }
 0x2e6   : > { %v1014_v8 = vadd.f32 %v2381_v0, %v1013_v7 }
 0x2e7   : > { %1926 = vtanh.f32 %v1019_v6 }
 0x2e8   : > { %1928 = vtanh.f32 %v1014_v8  ;;  %v1700_v9 = vpop.f32.mrb[14].mxu1 }
 0x2e9   : > { %v1029_v10 = vadd.f32 %v1700_v9, %v2381_v0  ;;  %v1023_v11 = vpop.f32.mrb[15].mxu1 }
 0x2ea   : > { %v1024_v12 = vadd.f32 %v2381_v0, %v1023_v11 }
 0x2eb   : > { %1930 = vtanh.f32 %v1029_v10 }
 0x2ec   : > { %1932 = vtanh.f32 %v1024_v12  ;;  %v1703_v13 = vpop.f32.mrb[16].mxu1 }
 0x2ed   : > { %v1923_v14 = vpop.eup %1922  ;;  %v1039_v15 = vadd.f32 %v1703_v13, %v2381_v0  ;;  %v1033_v16 = vpop.f32.mrb[17].mxu1 }
 0x2ee   : > { %v1925_v17 = vpop.eup %1924  ;;  %1099 = vst.msk [vmem:[#allocation2 + $0x8] sm:$0xff] %vm670_vm1, %v1923_v14  ;;  %v1034_v18 = vadd.f32 %v2381_v0, %v1033_v16 }
 0x2ef   : > { %1098 = vst.msk [vmem:[#allocation2] sm:$0xff] %vm670_vm1, %v1925_v17  ;;  %1934 = vtanh.f32 %v1039_v15 }
 0x2f0   : > { %1936 = vtanh.f32 %v1034_v18  ;;  %v1706_v19 = vpop.f32.mrb[18].mxu1 }
 0x2f1   : > { %v1927_v20 = vpop.eup %1926  ;;  %v1049_v21 = vadd.f32 %v1706_v19, %v2381_v0  ;;  %v1043_v22 = vpop.f32.mrb[19].mxu1 }
 0x2f2   : > { %v1929_v23 = vpop.eup %1928  ;;  %1101 = vst.msk [vmem:[#allocation2 + $0x18] sm:$0xff] %vm670_vm1, %v1927_v20  ;;  %v1044_v24 = vadd.f32 %v2381_v0, %v1043_v22 }
 0x2f3   : > { %1100 = vst.msk [vmem:[#allocation2 + $0x10] sm:$0xff] %vm670_vm1, %v1929_v23  ;;  %1938 = vtanh.f32 %v1049_v21 }
 0x2f4   : > { %1940 = vtanh.f32 %v1044_v24  ;;  %v1709_v25 = vpop.f32.mrb[20].mxu1 }
 0x2f5   : > { %v1931_v26 = vpop.eup %1930  ;;  %v1059_v27 = vadd.f32 %v1709_v25, %v2381_v0  ;;  %v1053_v28 = vpop.f32.mrb[21].mxu1 }
 0x2f6   : > { %v1933_v29 = vpop.eup %1932  ;;  %1103 = vst.msk [vmem:[#allocation2 + $0x28] sm:$0xff] %vm670_vm1, %v1931_v26  ;;  %v1054_v30 = vadd.f32 %v2381_v0, %v1053_v28 }
 0x2f7   : > { %1102 = vst.msk [vmem:[#allocation2 + $0x20] sm:$0xff] %vm670_vm1, %v1933_v29  ;;  %1942 = vtanh.f32 %v1059_v27 }
 0x2f8   : > { %1944 = vtanh.f32 %v1054_v30  ;;  %v1712_v31 = vpop.f32.mrb[22].mxu1 }
 0x2f9   : > { %v1935_v32 = vpop.eup %1934  ;;  %v1069_v33 = vadd.f32 %v1712_v31, %v2381_v0  ;;  %v1063_v34 = vpop.f32.mrb[23].mxu1 }
 0x2fa   : > { %v1937_v35 = vpop.eup %1936  ;;  %1105 = vst.msk [vmem:[#allocation2 + $0x38] sm:$0xff] %vm670_vm1, %v1935_v32  ;;  %v1064_v36 = vadd.f32 %v2381_v0, %v1063_v34 }
 0x2fb   : > { %1104 = vst.msk [vmem:[#allocation2 + $0x30] sm:$0xff] %vm670_vm1, %v1937_v35  ;;  %1946 = vtanh.f32 %v1069_v33 }
 0x2fc   : > { %1948 = vtanh.f32 %v1064_v36  ;;  %v1715_v37 = vpop.f32.mrb[24].mxu1 }
 0x2fd   : > { %v1939_v38 = vpop.eup %1938  ;;  %v1079_v39 = vadd.f32 %v1715_v37, %v2381_v0  ;;  %v1073_v40 = vpop.f32.mrb[25].mxu1 }
 0x2fe   : > { %v1941_v41 = vpop.eup %1940  ;;  %1107 = vst.msk [vmem:[#allocation2 + $0x48] sm:$0xff] %vm670_vm1, %v1939_v38  ;;  %v1074_v42 = vadd.f32 %v2381_v0, %v1073_v40 }
 0x2ff   : > { %1106 = vst.msk [vmem:[#allocation2 + $0x40] sm:$0xff] %vm670_vm1, %v1941_v41  ;;  %1950 = vtanh.f32 %v1079_v39 }
 0x300   : > { %1952 = vtanh.f32 %v1074_v42 }
 0x301   : > { %v1943_v43 = vpop.eup %1942 }
 0x302   : > { %v1945_v44 = vpop.eup %1944  ;;  %1109 = vst.msk [vmem:[#allocation2 + $0x58] sm:$0xff] %vm670_vm1, %v1943_v43 }
 0x303   : > { %1108 = vst.msk [vmem:[#allocation2 + $0x50] sm:$0xff] %vm670_vm1, %v1945_v44 }
 0x305   : > { %v1947_v45 = vpop.eup %1946 }
 0x306   : > { %v1949_v46 = vpop.eup %1948  ;;  %1111 = vst.msk [vmem:[#allocation2 + $0x68] sm:$0xff] %vm670_vm1, %v1947_v45 }
 0x307   : > { %1110 = vst.msk [vmem:[#allocation2 + $0x60] sm:$0xff] %vm670_vm1, %v1949_v46 }
 0x309   : > { %v1951_v47 = vpop.eup %1950 }
 0x30a   : > { %v1953_v48 = vpop.eup %1952  ;;  %1113 = vst.msk [vmem:[#allocation2 + $0x78] sm:$0xff] %vm670_vm1, %v1951_v47 }
 0x30b   : > { %1112 = vst.msk [vmem:[#allocation2 + $0x70] sm:$0xff] %vm670_vm1, %v1953_v48 }
 0x30c PF: > { %v1130_v49 = vld [vmem:[%s369_s16] sm:$0xff]  ;;  %v1131_v50 = vld [vmem:[%s369_s16 + $0x8] sm:$0xff]  ;;  %vm1139_vm2 = vcmask 130048   ;;  %s1553_s28 = sshll.u32 %s2052_s15, 5  ;;  %s1365_s29 = sshll.u32 %s2241_s27, 4  ;;  %s2460_s29 = int_to_ptr.vmem [resolvable:$true] %s1365_s29 }
 0x30d   : > { %v1114_v51 = vld [vmem:[#allocation2] sm:$0xff]  ;;  %v1760_v52 = vpack.c.bf16 %v1131_v50, %v1130_v49  ;;  %v1115_v54 = vld [vmem:[#allocation2 + $0x8] sm:$0xff]  ;;  %v1116_v56 = vld [vmem:[#allocation2 + $0x10] sm:$0xff]  ;;  %s2557_s22 = sld [smem:[#allocation15_spill]]  ;;  %s2558_s13 = sand.u32 1, %s2032_s10  }
 0x30e   : > { %1720 = vmatprep.mubr.msk.f32.mxu0 %vm1139_vm2, %v1114_v51  ;;  %v1122_v53 = vld [vmem:[#allocation2 + $0x40] sm:$0xff]  ;;  %v1123_v55 = vld [vmem:[#allocation2 + $0x48] sm:$0xff]  ;;  %v1124_v57 = vld [vmem:[#allocation2 + $0x50] sm:$0xff]  ;;  %s2468_s25 = scalar_lea.sflag [#allocation5], %s2558_s13  ;;  %s1954_s19 = scalar_lea.vmem %s2460_s29, 2048 }
 0x30f   : > { %1732 = vmatprep.mubr.msk.f32.mxu1 %vm1139_vm2, %v1122_v53  ;;  %1761 = vmatprep.subr.bf16.mxu0 %v1760_v52  ;;  %v1117_v58 = vld [vmem:[#allocation2 + $0x18] sm:$0xff]  ;;  %v1118_v60 = vld [vmem:[#allocation2 + $0x20] sm:$0xff]  ;;  %v1119_v62 = vld [vmem:[#allocation2 + $0x28] sm:$0xff]  ;;  %p1955_p6 = scmp.ne.s32.totalorder %s2460_s29, %s1954_s19  ;;  %s2066_s12 = smov [#allocation4]  }
 0x310   : > { %1766 = vmatprep.subr.bf16.mxu1 %v1760_v52  ;;  %1763 = vmatpush3.bf16.msra.mxu0 %v1760_v52  ;;  %v1125_v59 = vld [vmem:[#allocation2 + $0x58] sm:$0xff]  ;;  %v1126_v61 = vld [vmem:[#allocation2 + $0x60] sm:$0xff]  ;;  %v1127_v63 = vld [vmem:[#allocation2 + $0x68] sm:$0xff]  ;;  %s1958_s20 = sshll.u32 %s2066_s12, 4  ;;  %s1959_s20 = int_to_ptr.vmem [resolvable:$false] %s1958_s20 }
 0x311   : > { %1767 = vmatpush3.bf16.msra.mxu1 %v1760_v52  ;;  %v1120_v0 = vld [vmem:[#allocation2 + $0x30] sm:$0xff]  ;;  %v1121_v2 = vld [vmem:[#allocation2 + $0x38] sm:$0xff]  ;;  %v1530_v4 = vld [vmem:[%s418_s7] ss:$0 sm:$0xff]  ;;  %s1362_s7 = sadd.s32 %s2048_s14, %s1553_s28  ;;  %p1956_p7 = pnand %p1955_p6, %p2199_p10 }
 0x312   : > { %v1128_v1 = vld [vmem:[#allocation2 + $0x70] sm:$0xff]  ;;  %v1129_v3 = vld [vmem:[#allocation2 + $0x78] sm:$0xff]  ;;  %s1550_s15 = sshll.u32 %s1362_s7, 7  ;;  %s1960_s26 = scalar_lea.vmem %s1959_s20, 4096 }
 0x313   : > { %1721 = vmatmul.mubr.msk.f32.vlgmr.msra.gmra.mrb[0].mxu0 %vm1139_vm2, %v1115_v54  ;;  %s2458_s24 = scalar_lea.hbm %s2557_s22, %s1550_s15  ;;  %p1957_p8 = pneg %p1956_p7 }
 0x314   : > { %1733 = vmatmul.mubr.msk.f32.vlgmr.msra.gmra.mrb[0].mxu1 %vm1139_vm2, %v1123_v55  ;;  %1723 = vmatprep.mubr.msk.f32.mxu0 %vm1139_vm2, %v1116_v56  ;;  %p1961_p9 = scmp.lt.s32.totalorder %s2460_s29, %s1959_s20  ;;  %p1962_p11 = scmp.lt.s32.totalorder %s1960_s26, %s1954_s19 }
 0x315   : > { %1735 = vmatprep.mubr.msk.f32.mxu1 %vm1139_vm2, %v1124_v57 }
 0x316   : > { %p1963_p13 = por %p1962_p11, %p1961_p9 }
 0x317   : > { %1724 = vmatmul.mubr.msk.f32.gmra.mrb[2].mxu0 %vm1139_vm2, %v1117_v58 }
 0x318   : > { %1736 = vmatmul.mubr.msk.f32.gmra.mrb[2].mxu1 %vm1139_vm2, %v1125_v59  ;;  %1726 = vmatprep.mubr.msk.f32.mxu0 %vm1139_vm2, %v1118_v60  ;;  %p1964_p0 = pnand %p1963_p13, %p1957_p8 }
 0x319   : > { %1738 = vmatprep.mubr.msk.f32.mxu1 %vm1139_vm2, %v1126_v61 }
 0x31b   : > { %1727 = vmatmul.mubr.msk.f32.gmra.mrb[4].mxu0 %vm1139_vm2, %v1119_v62 }
 0x31c   : > { %1739 = vmatmul.mubr.msk.f32.gmra.mrb[4].mxu1 %vm1139_vm2, %v1127_v63  ;;  %1729 = vmatprep.mubr.msk.f32.mxu0 %vm1139_vm2, %v1120_v0 }
 0x31d   : > { %1741 = vmatprep.mubr.msk.f32.mxu1 %vm1139_vm2, %v1128_v1 }
 0x31f   : > { %1730 = vmatmul.mubr.msk.f32.gmra.mrb[6].mxu0 %vm1139_vm2, %v1121_v2 }
 0x320   : > { %1742 = vmatmul.mubr.msk.f32.gmra.mrb[6].mxu1 %vm1139_vm2, %v1129_v3 }
 0x3e6   : > { %v1722_v5 = vpop.f32.mrb[0].mxu0 }
 0x3e7   : > { %v1734_v6 = vpop.f32.mrb[0].mxu1  ;;  %v1260_v7 = vadd.f32 %v1722_v5, %v1530_v4  ;;  %v1254_v9 = vpop.f32.mrb[1].mxu0 }
 0x3e8   : > { %v1300_v8 = vadd.f32 %v1734_v6, %v1530_v4  ;;  %v1294_v10 = vpop.f32.mrb[1].mxu1  ;;  %v1255_v11 = vadd.f32 %v1530_v4, %v1254_v9 }
 0x3e9   : > { %v1295_v12 = vadd.f32 %v1530_v4, %v1294_v10  ;;  %1334 = vst [vmem:[%s2241_s27 + $0x8] sm:$0xff] %v1260_v7 }
 0x3ea   : > { %1342 = vst [vmem:[%s2241_s27 + $0x48] sm:$0xff] %v1300_v8  ;;  %1333 = vst [vmem:[%s2241_s27] sm:$0xff] %v1255_v11  ;;  %v1725_v13 = vpop.f32.mrb[2].mxu0 }
 0x3eb   : > { %1341 = vst [vmem:[%s2241_s27 + $0x40] sm:$0xff] %v1295_v12  ;;  %v1737_v14 = vpop.f32.mrb[2].mxu1  ;;  %v1270_v15 = vadd.f32 %v1725_v13, %v1530_v4  ;;  %v1264_v17 = vpop.f32.mrb[3].mxu0 }
 0x3ec   : > { %v1310_v16 = vadd.f32 %v1737_v14, %v1530_v4  ;;  %v1304_v18 = vpop.f32.mrb[3].mxu1  ;;  %v1265_v19 = vadd.f32 %v1530_v4, %v1264_v17 }
 0x3ed   : > { %v1305_v20 = vadd.f32 %v1530_v4, %v1304_v18  ;;  %1336 = vst [vmem:[%s2241_s27 + $0x18] sm:$0xff] %v1270_v15 }
 0x3ee   : > { %1344 = vst [vmem:[%s2241_s27 + $0x58] sm:$0xff] %v1310_v16  ;;  %1335 = vst [vmem:[%s2241_s27 + $0x10] sm:$0xff] %v1265_v19  ;;  %v1728_v21 = vpop.f32.mrb[4].mxu0 }
 0x3ef   : > { %1343 = vst [vmem:[%s2241_s27 + $0x50] sm:$0xff] %v1305_v20  ;;  %v1740_v22 = vpop.f32.mrb[4].mxu1  ;;  %v1280_v23 = vadd.f32 %v1728_v21, %v1530_v4  ;;  %v1274_v25 = vpop.f32.mrb[5].mxu0 }
 0x3f0   : > { %v1320_v24 = vadd.f32 %v1740_v22, %v1530_v4  ;;  %v1314_v26 = vpop.f32.mrb[5].mxu1  ;;  %v1275_v27 = vadd.f32 %v1530_v4, %v1274_v25 }
 0x3f1   : > { %v1315_v28 = vadd.f32 %v1530_v4, %v1314_v26  ;;  %1338 = vst [vmem:[%s2241_s27 + $0x28] sm:$0xff] %v1280_v23 }
 0x3f2   : > { %1346 = vst [vmem:[%s2241_s27 + $0x68] sm:$0xff] %v1320_v24  ;;  %1337 = vst [vmem:[%s2241_s27 + $0x20] sm:$0xff] %v1275_v27  ;;  %v1731_v29 = vpop.f32.mrb[6].mxu0 }
 0x3f3   : > { %1345 = vst [vmem:[%s2241_s27 + $0x60] sm:$0xff] %v1315_v28  ;;  %v1743_v30 = vpop.f32.mrb[6].mxu1  ;;  %v1290_v31 = vadd.f32 %v1731_v29, %v1530_v4  ;;  %v1284_v33 = vpop.f32.mrb[7].mxu0 }
 0x3f4   : > { %v1330_v32 = vadd.f32 %v1743_v30, %v1530_v4  ;;  %v1324_v34 = vpop.f32.mrb[7].mxu1  ;;  %v1285_v35 = vadd.f32 %v1530_v4, %v1284_v33 }
 0x3f5   : > { %v1325_v36 = vadd.f32 %v1530_v4, %v1324_v34  ;;  %1340 = vst [vmem:[%s2241_s27 + $0x38] sm:$0xff] %v1290_v31 }
 0x3f6   : > { %1348 = vst [vmem:[%s2241_s27 + $0x78] sm:$0xff] %v1330_v32  ;;  %1339 = vst [vmem:[%s2241_s27 + $0x30] sm:$0xff] %v1285_v35 }
 0x3f7   : > { %1347 = vst [vmem:[%s2241_s27 + $0x70] sm:$0xff] %v1325_v36 }
 0x3f8   : > { %1967 = shalt.err (!%p1964_p0)
}
 0x3f9   : > { %s1968_s27 = scalar_lea.hbm %s2458_s24, 2048  ;;  %s1972_s28 = scalar_lea.hbm %s2557_s22, 8192 }
 0x3fa   : > { %p1969_p1 = scmp.ne.s32.totalorder %s2458_s24, %s1968_s27  ;;  %p1973_p4 = scmp.lt.u32.totalorder %s2458_s24, %s2557_s22 }
 0x3fb   : > { %p1974_p5 = scmp.lt.u32.totalorder %s1972_s28, %s1968_s27  ;;  %p1976_p7 = scmp.lt.u32.totalorder %s1968_s27, %s2458_s24 }
 0x3fc   : > { %p1970_p2 = pnand %p1969_p1, %p2199_p10 }
 0x3fd   : > { %p1975_p6 = por %p1974_p5, %p1973_p4 }
 0x3fe   : > { %p1971_p3 = pneg %p1970_p2 }
 0x3ff   : > { %p1977_p8 = por %p1976_p7, %p1975_p6 }
 0x401   : > { %p1978_p9 = pnand %p1977_p8, %p1971_p3 }
 0x403   : > { %1981 = shalt.err (!%p1978_p9)
}
 0x404   : > { %s2067_s14 = smov 128   ;;  %s2068_s17 = smov 256  }
 0x405   : > { %s2069_s13 = smov 8  }
 0x406   : > { %1768 = dma.vmem_to_hbm [thread:$0]  (%p2199_p10), %s2460_s29, 2048, %s2458_s24, %s2468_s25, %s2067_s14, %s2068_s17, %s2069_s13  }
 0x407 PF: > { %p1774_p11 = scmp.ge.s32.totalorder %s2064_s18, 2  ;;  %s1380_s19 = sand.u32 1, %s2028_s30  }
 0x408   : > { %s1381_s12 = scalar_lea.sflag [#allocation5], %s1380_s19 }
 0x409   : > { %p1771_p13 = pnand %p1774_p11, %p2206_p12 }
 0x40b   : > { %2023 = dma.done.wait (!%p1771_p13), %s1381_s12, 2048  }
 0x40c   : > { %2025 = vsyncadd (!%p1771_p13), %s1381_s12, 4294965248  ;;  %s22_s18 = sadd.s32 1, %s2064_s18   ;;  %s2559_s12 = sld [smem:[#allocation7_spill]] }
 0x40d   : > { %p19_p0 = scmp.ge.s32.totalorder %s22_s18, 6   ;;  %s2560_s13 = sld [smem:[#allocation12_spill]] }
 0x40e   : > { %s2561_s14 = sld [smem:[#allocation8_spill]]  ;;  %s2562_s15 = sld [smem:[#allocation9_spill]] }
 0x40f   : > { %s2563_s16 = sld [smem:[#allocation10_spill]]  ;;  %s2564_s17 = sld [smem:[#allocation11_spill]] }
 0x410   : > { %s2565_s30 = smov %s2032_s10  ;;  %s2566_s10 = smov %s2036_s11 }
 0x411   : > { %s2567_s11 = smov %s2204_s9  ;;  %21 = sbr.rel (!%p19_p0) target bundleno = 10 (0xa), region = 144 }
 0x418   :  { %1386 = vsyncpa [#allocation5], 1 }
 0x419   :  { %1388 = vsyncpa [#allocation5 + $0x1], 1 }

</bundles_post_ra>
